<compile_context>
chip_gen: v7x
topology: tpu7x:2x2x1
jax: 0.10.0
libtpu: 0.0.40
codegen_flags: <defaults>
</compile_context>

<pallas_src>
import jax
import jax.numpy as jnp
from jax import lax
from jax.experimental import pallas as pl
from jax.experimental.pallas import tpu as pltpu

_LANES = 128


def _round_up(x, m):
    return ((x + m - 1) // m) * m


def _nll_loss_kernel(pred_ref, target_ref, out_ref, acc_ref):
    """Grid = (batch tiles, class tiles). Class axis is the reduction axis."""
    k = pl.program_id(1)

    @pl.when(k == 0)
    def _init():
        acc_ref[...] = jnp.zeros_like(acc_ref)

    pred = pred_ref[...].astype(jnp.float32)          # (tile_b, tile_c)
    tgt = target_ref[...]                             # (tile_b, 1) int32
    tb, tc = pred.shape

    # Global class id of each lane in this tile; one-hot select of the target
    # column via iota compare (at most one nonzero per row).
    col_ids = lax.broadcasted_iota(jnp.int32, (tb, tc), dimension=1) + k * tc
    masked = jnp.where(col_ids == tgt, pred, 0.0)

    # Accumulate 128-lane blocks element-wise (VPU only); defer the cross-lane
    # (XLU) reduction to the final grid step.
    acc = acc_ref[...]
    for j in range(tc // _LANES):
        acc = acc + masked[:, j * _LANES:(j + 1) * _LANES]
    acc_ref[...] = acc

    @pl.when(k == pl.num_programs(1) - 1)
    def _finalize():
        out_ref[...] = -jnp.sum(acc_ref[...], axis=-1, keepdims=True)


def custom_nll_loss(pred, target, reduction="mean"):
    """Pallas implementation of CustomNLLLoss.forward.

    pred:   (B, C) float32/bfloat16 log-probabilities
    target: (B,)   integer class indices in [0, C)
    """
    b, c = pred.shape

    # ---- tile / padding selection ------------------------------------------
    c_pad = _round_up(c, _LANES)
    tile_c = min(c_pad, 1024)                 # lane-dense class tiles
    c_pad = _round_up(c_pad, tile_c)

    b_pad = _round_up(b, 8)
    tile_b = min(b_pad, 256)                  # sublane-aligned batch tiles
    b_pad = _round_up(b_pad, tile_b)
    # VMEM: 2 * tile_b*tile_c*itemsize (double-buffered pred) + small target,
    # output and (tile_b, 128) f32 scratch  ->  <= ~2 MiB f32, well under the
    # v7x 32 MiB default scoped limit.

    target = target.astype(jnp.int32)
    if (b_pad, c_pad) != (b, c):
        pred = jnp.pad(pred, ((0, b_pad - b), (0, c_pad - c)))
    if b_pad != b:
        target = jnp.pad(target, (0, b_pad - b))
    target2d = target.reshape(b_pad, 1)

    grid = (b_pad // tile_b, c_pad // tile_c)

    itemsize = jnp.dtype(pred.dtype).itemsize
    cost = pl.CostEstimate(
        flops=2 * b_pad * c_pad,
        transcendentals=0,
        bytes_accessed=b_pad * c_pad * itemsize + 2 * b_pad * 4,
    )

    per_row = pl.pallas_call(
        _nll_loss_kernel,
        out_shape=jax.ShapeDtypeStruct((b_pad, 1), jnp.float32),
        grid=grid,
        in_specs=[
            pl.BlockSpec((tile_b, tile_c), lambda i, k: (i, k)),   # pred
            pl.BlockSpec((tile_b, 1), lambda i, k: (i, 0)),        # target
        ],
        out_specs=pl.BlockSpec((tile_b, 1), lambda i, k: (i, 0)),
        scratch_shapes=[pltpu.VMEM((tile_b, _LANES), jnp.float32)],
        compiler_params=pltpu.CompilerParams(
            dimension_semantics=("parallel", "arbitrary"),
        ),
        cost_estimate=cost,
    )(pred, target2d)

    loss = per_row[:b, 0]
    if reduction == "mean":
        return jnp.mean(loss)          # divide by the true global batch size
    elif reduction == "sum":
        return jnp.sum(loss)
    else:
        return loss


if __name__ == "__main__":
    key = jax.random.PRNGKey(0)
    k1, k2, k3, k4 = jax.random.split(key, 4)

    # --- small shape consistent with the module ---
    B, C = 8, 32
    logits = jax.random.normal(k1, (B, C), dtype=jnp.float32)
    pred = jax.nn.log_softmax(logits, axis=-1)
    target = jax.random.randint(k2, (B,), 0, C, dtype=jnp.int32)

    loss = jax.block_until_ready(custom_nll_loss(pred, target, "mean"))
    ref = jnp.mean(-pred[jnp.arange(B), target])
    assert jnp.allclose(loss, ref, atol=1e-6, rtol=1e-6), (loss, ref)

    loss_sum = jax.block_until_ready(custom_nll_loss(pred, target, "sum"))
    ref_sum = jnp.sum(-pred[jnp.arange(B), target])
    assert jnp.allclose(loss_sum, ref_sum, atol=1e-5, rtol=1e-6), (loss_sum, ref_sum)

    loss_none = jax.block_until_ready(custom_nll_loss(pred, target, "none"))
    ref_none = -pred[jnp.arange(B), target]
    assert jnp.allclose(loss_none, ref_none, atol=1e-6, rtol=1e-6)

    # --- larger shape exercising the (batch, class) grid, padding and bf16 ---
    B2, C2 = 272, 2176
    logits2 = jax.random.normal(k3, (B2, C2), dtype=jnp.float32)
    pred2 = jax.nn.log_softmax(logits2, axis=-1).astype(jnp.bfloat16)
    target2 = jax.random.randint(k4, (B2,), 0, C2, dtype=jnp.int32)

    loss2 = jax.block_until_ready(custom_nll_loss(pred2, target2, "mean"))
    ref2 = jnp.mean(-pred2.astype(jnp.float32)[jnp.arange(B2), target2])
    assert jnp.allclose(loss2, ref2, atol=1e-5, rtol=1e-5), (loss2, ref2)

    print("KERNEL_OK")
</pallas_src>

<mosaic_0001>
module attributes {stable_mosaic.version = 11 : i64} {
  func.func @_nll_loss_kernel(%arg0: i32, %arg1: i32, %arg2: memref<8x128xf32, #tpu.memory_space<vmem>>, %arg3: memref<8x1xi32, #tpu.memory_space<vmem>>, %arg4: memref<8x1xf32, #tpu.memory_space<vmem>>, %arg5: memref<8x128xf32, #tpu.memory_space<vmem>>) attributes {dimension_semantics = [#tpu.dimension_semantics<parallel>, #tpu.dimension_semantics<arbitrary>], iteration_bounds = array<i64: 1, 1>, scalar_prefetch = 0 : i64, scratch_operands = 1 : i64, tpu.core_type = #tpu.core_type<tc>, window_params = [{transform_indices = @transform_0, window_bounds = array<i64: 8, 128>}, {transform_indices = @transform_1, window_bounds = array<i64: 8, 1>}, {transform_indices = @transform_2, window_bounds = array<i64: 8, 1>}]} {
    %c0_i32 = arith.constant 0 : i32
    %0 = arith.cmpi eq, %arg1, %c0_i32 : i32
    %1 = arith.extui %0 : i1 to i32
    %c0_i32_0 = arith.constant 0 : i32
    %2 = arith.cmpi ne, %1, %c0_i32_0 : i32
    scf.if %2 {
      %cst_10 = arith.constant 0.000000e+00 : f32
      %19 = vector.broadcast %cst_10 : f32 to vector<8x128xf32>
      %c0_11 = arith.constant 0 : index
      %c0_12 = arith.constant 0 : index
      %20 = vector.load %arg5[%c0_11, %c0_12] : memref<8x128xf32, #tpu.memory_space<vmem>>, vector<8x128xf32>
      tpu.vector_store %arg5[%c0_11, %c0_12], %19 {strides = array<i32>} : memref<8x128xf32, #tpu.memory_space<vmem>>, vector<8x128xf32>,
    } else {
    }
    %c0 = arith.constant 0 : index
    %c0_1 = arith.constant 0 : index
    %3 = vector.load %arg2[%c0, %c0_1] : memref<8x128xf32, #tpu.memory_space<vmem>>, vector<8x128xf32>
    %c0_2 = arith.constant 0 : index
    %c0_3 = arith.constant 0 : index
    %4 = vector.load %arg3[%c0_2, %c0_3] : memref<8x1xi32, #tpu.memory_space<vmem>>, vector<8x1xi32>
    %5 = tpu.iota {dimensions = array<i32: 1>} : vector<8x128xi32>
    %c128_i32 = arith.constant 128 : i32
    %6 = arith.muli %arg1, %c128_i32 : i32
    %7 = vector.broadcast %6 : i32 to vector<8x128xi32>
    %8 = arith.addi %5, %7 : vector<8x128xi32>
    %9 = vector.broadcast %4 : vector<8x1xi32> to vector<8x128xi32>
    %10 = arith.cmpi eq, %8, %9 : vector<8x128xi32>
    %cst = arith.constant 0.000000e+00 : f32
    %11 = vector.broadcast %cst : f32 to vector<8x128xf32>
    %12 = arith.select %10, %3, %11 : vector<8x128xi1>, vector<8x128xf32>
    %c0_4 = arith.constant 0 : index
    %c0_5 = arith.constant 0 : index
    %13 = vector.load %arg5[%c0_4, %c0_5] : memref<8x128xf32, #tpu.memory_space<vmem>>, vector<8x128xf32>
    %14 = arith.addf %13, %12 : vector<8x128xf32>
    %c0_6 = arith.constant 0 : index
    %c0_7 = arith.constant 0 : index
    %15 = vector.load %arg5[%c0_6, %c0_7] : memref<8x128xf32, #tpu.memory_space<vmem>>, vector<8x128xf32>
    tpu.vector_store %arg5[%c0_6, %c0_7], %14 {strides = array<i32>} : memref<8x128xf32, #tpu.memory_space<vmem>>, vector<8x128xf32>,
    %c0_i32_8 = arith.constant 0 : i32
    %16 = arith.cmpi eq, %arg1, %c0_i32_8 : i32
    %17 = arith.extui %16 : i1 to i32
    %c0_i32_9 = arith.constant 0 : i32
    %18 = arith.cmpi ne, %17, %c0_i32_9 : i32
    scf.if %18 {
      %c0_10 = arith.constant 0 : index
      %c0_11 = arith.constant 0 : index
      %19 = vector.load %arg5[%c0_10, %c0_11] : memref<8x128xf32, #tpu.memory_space<vmem>>, vector<8x128xf32>
      %cst_12 = arith.constant dense<0.000000e+00> : vector<8xf32>
      %20 = vector.multi_reduction <add>, %19, %cst_12 [1] : vector<8x128xf32> to vector<8xf32>
      %21 = vector.shape_cast %20 : vector<8xf32> to vector<8x1xf32>
      %cst_13 = arith.constant 0.000000e+00 : f32
      %22 = vector.broadcast %cst_13 : f32 to vector<8x1xf32>
      %23 = arith.subf %22, %21 : vector<8x1xf32>
      %c0_14 = arith.constant 0 : index
      %c0_15 = arith.constant 0 : index
      %24 = vector.load %arg4[%c0_14, %c0_15] : memref<8x1xf32, #tpu.memory_space<vmem>>, vector<8x1xf32>
      tpu.vector_store %arg4[%c0_14, %c0_15], %23 {strides = array<i32>} : memref<8x1xf32, #tpu.memory_space<vmem>>, vector<8x1xf32>,
    } else {
    }
    return
  }
  func.func @transform_0(%arg0: i32, %arg1: i32) -> (i32, i32) {
    %c0_i32 = arith.constant 0 : i32
    return %arg0, %arg1 : i32, i32
  }
  func.func @transform_1(%arg0: i32, %arg1: i32) -> (i32, i32) {
    %c0_i32 = arith.constant 0 : i32
    %c0_i32_0 = arith.constant 0 : i32
    return %arg0, %c0_i32 : i32, i32
  }
  func.func @transform_2(%arg0: i32, %arg1: i32) -> (i32, i32) {
    %c0_i32 = arith.constant 0 : i32
    %c0_i32_0 = arith.constant 0 : i32
    return %arg0, %c0_i32 : i32, i32
  }
}

</mosaic_0001>

<bundles_post_ra>
// kernel: tpu_custom_call.1
= control target key start
LH: loop header
LB: loop body
LE: loop exit
PB: predicated region body
PF: predicated region fallthrough
CT: control target
= control target key end

     0   :  { %v46_v0 = vmov 0   ;;  %v18_v2 = vlaneseq  ;;  %vm38_vm1 = vcmask 7168   ;;  %s71_s1 = inlined_call_operand.vmem [shape: s32[8,1], index: 1, kind: input, shape index: {}]   ;;  %s72_s0 = inlined_call_operand.vmem [shape: f32[8,128], index: 0, kind: input, shape index: {}]   ;;  %s73_s2 = inlined_call_operand.vmem [shape: f32[8,1], index: 2, kind: output, shape index: {}]  }
   0x1   :  { %45 = vset.pattern.permute.xlu0 %v46_v0  ;;  %v17_v1 = vld [vmem:[%s71_s1] sm:$0xff] }
   0x2   :  { %24 = vperm.xlu0 %45, %v17_v1   ;;  %v19_v3 = vand.u32 127, %v18_v2  ;;  %v16_v4 = vld [vmem:[%s72_s0] sm:$0xff] }
  0x81   :  { %v25_v5 = vpop.permute.xlu0 %24 }
  0x82   :  { %vm26_vm0 = vcmp.eq.s32.totalorder %v19_v3, %v25_v5 }
  0x83   :  { %v27_v6 = vsel %vm26_vm0, %v16_v4, 0.0 }
  0x84   :  { %35 = vadd.xlane.f32.xlu0 %v27_v6 }
 0x111   :  { %v36_v7 = vpop.xlane.xlu0 %35 }
 0x112   :  { %v37_v8 = vsub.f32 0.0, %v36_v7 }
 0x114   :  { %39 = vst.msk [vmem:[%s73_s2] sm:$0xff] %vm38_vm1, %v37_v8 }

</bundles_post_ra>
